<compile_context>
chip_gen: v5e
topology: v5e:2x2
jax: 0.10.0
libtpu: 0.0.40
codegen_flags: <defaults>
</compile_context>

<pallas_src>
import functools
import math

import jax
import jax.numpy as jnp
from jax.experimental import pallas as pl
from jax.experimental.pallas import tpu as pltpu


def _round_up(x, m):
    return (x + m - 1) // m * m


def _tpu_budgets():
    """(per-input-block byte target, vmem_limit_bytes) tuned per generation."""
    kind = ""
    try:
        kind = jax.devices()[0].device_kind.lower().replace(" ", "")
    except Exception:
        pass
    if "v5lite" in kind or "v5e" in kind:
        # v5e: ~0.8 TB/s HBM, 16 MiB scoped-VMEM default -> keep 4 MiB blocks.
        return 4 * 1024 * 1024, 32 * 1024 * 1024
    if "v6" in kind:
        # v6e: ~1.4 TB/s HBM, 128 MiB physical VMEM -> larger blocks are free.
        return 8 * 1024 * 1024, 64 * 1024 * 1024
    if "v7" in kind or "7x" in kind:
        # v7x: 3.2 TB/s HBM but only 64 MiB physical VMEM per TensorCore.
        return 8 * 1024 * 1024, 44 * 1024 * 1024
    # Unknown generation: conservative sizes that fit every scoped budget.
    return 4 * 1024 * 1024, 32 * 1024 * 1024


def _avg_kernel(x_ref, o_ref, acc_ref, *, inv_n, total_cols, mask_cols):
    # x_ref: [tile_rows, tile_cols] block; o_ref: [tile_rows, 1] block.
    j = pl.program_id(1)

    @pl.when(j == 0)
    def _():
        acc_ref[...] = jnp.zeros_like(acc_ref)

    x = x_ref[...]
    if mask_cols:
        # Reduction (column) axis is tiled and ragged: zero out-of-bounds
        # lanes of the last column tile (compute is free; kernel is HBM-bound).
        tile_cols = x_ref.shape[-1]
        col_ids = jax.lax.broadcasted_iota(jnp.int32, x_ref.shape, 1)
        x = jnp.where(col_ids + j * tile_cols < total_cols, x, 0)

    # Single cross-lane reduce with the f32 upcast fused into it (avoids
    # materializing a full f32 copy of a bf16 tile -> less vreg pressure).
    acc_ref[...] += jnp.sum(x, axis=-1, keepdims=True, dtype=jnp.float32)

    @pl.when(j == pl.num_programs(1) - 1)
    def _():
        # Scale once by the compile-time constant 1/(H*W); cast on store.
        o_ref[...] = (acc_ref[...] * inv_n).astype(o_ref.dtype)


def avg_forward(x, *, min_pallas_bytes=1 << 20, _target_bytes=None):
    """Pallas equivalent of Avg.forward: mean over the last two axes."""
    assert x.ndim >= 2, "Avg expects at least two trailing axes to reduce."
    lead = x.shape[:-2]
    rows = math.prod(lead) if lead else 1
    cols = x.shape[-2] * x.shape[-1]
    itemsize = jnp.dtype(x.dtype).itemsize

    # Tiny feature maps: a single-step Pallas grid is pure launch overhead;
    # a plain XLA mean fuses with neighbouring ops and is strictly faster.
    if rows * cols * itemsize < min_pallas_bytes:
        return jnp.mean(x, axis=(-2, -1))

    x2 = x.reshape(rows, cols)          # free layout plumbing (contiguous)
    inv_n = 1.0 / float(cols)

    target_bytes, vmem_limit = _tpu_budgets()
    if _target_bytes is not None:       # test hook: force the tiled-cols path
        target_bytes = _target_bytes

    # Sublane alignment for the row axis: 8 for f32, 16 for bf16, 32 for int8.
    row_align = max(8, 32 // itemsize)
    row_granule = row_align if rows >= row_align else rows

    if cols * itemsize * row_granule <= target_bytes:
        # Whole reduction axis resident in one block; tile over rows only.
        tile_cols = cols
        mask_cols = False
        if rows < row_align:
            tile_rows = rows            # block dim == full dim: always legal
        else:
            vmem_rows = (target_bytes // (cols * itemsize)) // row_align * row_align
            # Guarantee >= 2 row tiles so the "parallel" axis can shard across
            # TensorCores (v7x megacore) and DMA/compute can overlap.
            half_rows = max(row_align,
                            (_round_up(rows, row_align) // 2) // row_align * row_align)
            tile_rows = max(row_align, min(vmem_rows, half_rows))
    else:
        # Very large spatial extent: also tile the reduction axis and
        # accumulate across the trailing "arbitrary" grid axis.
        tile_rows = row_granule
        tile_cols = max(128, (target_bytes // (tile_rows * itemsize)) // 128 * 128)
        tile_cols = min(tile_cols, _round_up(cols, 128))
        mask_cols = (cols % tile_cols) != 0

    grid = (pl.cdiv(rows, tile_rows), pl.cdiv(cols, tile_cols))

    kernel = functools.partial(
        _avg_kernel, inv_n=inv_n, total_cols=cols, mask_cols=mask_cols)

    out = pl.pallas_call(
        kernel,
        out_shape=jax.ShapeDtypeStruct((rows, 1), x.dtype),
        grid_spec=pltpu.PrefetchScalarGridSpec(
            num_scalar_prefetch=0,
            grid=grid,
            in_specs=[pl.BlockSpec((tile_rows, tile_cols),
                                   lambda i, j: (i, j))],
            out_specs=pl.BlockSpec((tile_rows, 1), lambda i, j: (i, 0)),
            scratch_shapes=[pltpu.VMEM((tile_rows, 1), jnp.float32)],
        ),
        compiler_params=pltpu.CompilerParams(
            # Rows are independent (shardable across TensorCores);
            # the trailing axis is the reduction -> "arbitrary".
            dimension_semantics=("parallel", "arbitrary"),
            vmem_limit_bytes=vmem_limit,
        ),
        cost_estimate=pl.CostEstimate(
            flops=rows * cols,
            transcendentals=0,
            bytes_accessed=rows * cols * itemsize + rows * itemsize,
        ),
    )(x2)

    return out[:, 0].reshape(lead)


if __name__ == "__main__":
    key = jax.random.PRNGKey(0)

    # Small NCHW feature map consistent with the discriminator module.
    B, C, H, W = 2, 4, 16, 16
    x = jax.random.normal(key, (B, C, H, W), dtype=jnp.float32)
    ref = jnp.mean(jnp.mean(x, axis=-1), axis=-1)

    # Force the Pallas path (the default would take the tiny-input fallback).
    out = jax.block_until_ready(avg_forward(x, min_pallas_bytes=0))
    assert out.shape == (B, C)
    assert jnp.allclose(out, ref, atol=1e-5, rtol=1e-5)

    # Default path (small-input fallback) must agree too.
    out_fb = jax.block_until_ready(avg_forward(x))
    assert jnp.allclose(out_fb, ref, atol=1e-5, rtol=1e-5)

    # bf16 input: f32 accumulation in-kernel, cast only on the final store.
    xb = x.astype(jnp.bfloat16)
    out_b = jax.block_until_ready(avg_forward(xb, min_pallas_bytes=0))
    assert jnp.allclose(out_b.astype(jnp.float32), ref, atol=1e-2, rtol=1e-2)

    # Ragged rows (B*C = 10, not a multiple of the row tile): exercises the
    # pad-free over-run of the "parallel" row grid axis.
    x3 = jax.random.normal(jax.random.PRNGKey(1), (2, 5, 16, 16), jnp.float32)
    ref3 = jnp.mean(jnp.mean(x3, axis=-1), axis=-1)
    out3 = jax.block_until_ready(avg_forward(x3, min_pallas_bytes=0))
    assert jnp.allclose(out3, ref3, atol=1e-5, rtol=1e-5)

    # Tiled-reduction (huge-cols) branch with the in-kernel column mask,
    # exercised at a small size via the block-size test hook.
    x4 = jax.random.normal(jax.random.PRNGKey(2), (2, 8, 16, 20), jnp.float32)
    ref4 = jnp.mean(jnp.mean(x4, axis=-1), axis=-1)
    out4 = jax.block_until_ready(
        avg_forward(x4, min_pallas_bytes=0, _target_bytes=8 * 1024))
    assert jnp.allclose(out4, ref4, atol=1e-5, rtol=1e-5)

    print("KERNEL_OK")
</pallas_src>

<mosaic_0001>
module attributes {stable_mosaic.version = 11 : i64} {
  func.func @_avg_kernel(%arg0: i32, %arg1: i32, %arg2: memref<8x256xf32, #tpu.memory_space<vmem>>, %arg3: memref<8x1xf32, #tpu.memory_space<vmem>>, %arg4: memref<8x1xf32, #tpu.memory_space<vmem>>) attributes {dimension_semantics = [#tpu.dimension_semantics<parallel>, #tpu.dimension_semantics<arbitrary>], iteration_bounds = array<i64: 1, 1>, scalar_prefetch = 0 : i64, scratch_operands = 1 : i64, tpu.core_type = #tpu.core_type<tc>, window_params = [{transform_indices = @transform_0, window_bounds = array<i64: 8, 256>}, {transform_indices = @transform_1, window_bounds = array<i64: 8, 1>}]} {
    %c0_i32 = arith.constant 0 : i32
    %0 = arith.cmpi eq, %arg1, %c0_i32 : i32
    %1 = arith.extui %0 : i1 to i32
    %c0_i32_0 = arith.constant 0 : i32
    %2 = arith.cmpi ne, %1, %c0_i32_0 : i32
    scf.if %2 {
      %cst_8 = arith.constant 0.000000e+00 : f32
      %12 = vector.broadcast %cst_8 : f32 to vector<8x1xf32>
      %c0_9 = arith.constant 0 : index
      %c0_10 = arith.constant 0 : index
      %13 = vector.load %arg4[%c0_9, %c0_10] : memref<8x1xf32, #tpu.memory_space<vmem>>, vector<8x1xf32>
      tpu.vector_store %arg4[%c0_9, %c0_10], %12 {strides = array<i32>} : memref<8x1xf32, #tpu.memory_space<vmem>>, vector<8x1xf32>,
    } else {
    }
    %c0 = arith.constant 0 : index
    %c0_1 = arith.constant 0 : index
    %3 = vector.load %arg2[%c0, %c0_1] : memref<8x256xf32, #tpu.memory_space<vmem>>, vector<8x256xf32>
    %c0_2 = arith.constant 0 : index
    %c0_3 = arith.constant 0 : index
    %4 = vector.load %arg4[%c0_2, %c0_3] : memref<8x1xf32, #tpu.memory_space<vmem>>, vector<8x1xf32>
    %cst = arith.constant dense<0.000000e+00> : vector<8xf32>
    %5 = vector.multi_reduction <add>, %3, %cst [1] : vector<8x256xf32> to vector<8xf32>
    %6 = vector.shape_cast %5 : vector<8xf32> to vector<8x1xf32>
    %7 = arith.addf %4, %6 : vector<8x1xf32>
    %c0_4 = arith.constant 0 : index
    %c0_5 = arith.constant 0 : index
    %8 = vector.load %arg4[%c0_4, %c0_5] : memref<8x1xf32, #tpu.memory_space<vmem>>, vector<8x1xf32>
    tpu.vector_store %arg4[%c0_4, %c0_5], %7 {strides = array<i32>} : memref<8x1xf32, #tpu.memory_space<vmem>>, vector<8x1xf32>,
    %c0_i32_6 = arith.constant 0 : i32
    %9 = arith.cmpi eq, %arg1, %c0_i32_6 : i32
    %10 = arith.extui %9 : i1 to i32
    %c0_i32_7 = arith.constant 0 : i32
    %11 = arith.cmpi ne, %10, %c0_i32_7 : i32
    scf.if %11 {
      %c0_8 = arith.constant 0 : index
      %c0_9 = arith.constant 0 : index
      %12 = vector.load %arg4[%c0_8, %c0_9] : memref<8x1xf32, #tpu.memory_space<vmem>>, vector<8x1xf32>
      %cst_10 = arith.constant 3.906250e-03 : f32
      %13 = vector.broadcast %cst_10 : f32 to vector<8x1xf32>
      %14 = arith.mulf %12, %13 : vector<8x1xf32>
      %c0_11 = arith.constant 0 : index
      %c0_12 = arith.constant 0 : index
      %15 = vector.load %arg3[%c0_11, %c0_12] : memref<8x1xf32, #tpu.memory_space<vmem>>, vector<8x1xf32>
      tpu.vector_store %arg3[%c0_11, %c0_12], %14 {strides = array<i32>} : memref<8x1xf32, #tpu.memory_space<vmem>>, vector<8x1xf32>,
    } else {
    }
    return
  }
  func.func @transform_0(%arg0: i32, %arg1: i32) -> (i32, i32) {
    %c0_i32 = arith.constant 0 : i32
    return %arg0, %arg1 : i32, i32
  }
  func.func @transform_1(%arg0: i32, %arg1: i32) -> (i32, i32) {
    %c0_i32 = arith.constant 0 : i32
    %c0_i32_0 = arith.constant 0 : i32
    return %arg0, %c0_i32 : i32, i32
  }
}

</mosaic_0001>

<bundles_post_ra>
// kernel: tpu_custom_call.1
= control target key start
LH: loop header
LB: loop body
LE: loop exit
PB: predicated region body
PF: predicated region fallthrough
CT: control target
= control target key end

     0   :  { %6 = vsyncpa [#allocation4], 0  ;;  %s76_s9 = smov [#allocation3]   ;;  %s94_s0 = inlined_call_operand.hbm [shape: f32[8,256], index: 0, kind: input, shape index: {}]   ;;  %s95_s1 = inlined_call_operand.vmem [shape: f32[8,1], index: 1, kind: output, shape index: {}]  }
   0x1   :  { %s12_s8 = sshll.u32 %s94_s0, 4  ;;  %s14_s10 = sshll.u32 %s76_s9, 4  ;;  %s13_s8 = int_to_ptr.hbm [resolvable:$true] %s12_s8  ;;  %s15_s10 = int_to_ptr.vmem [resolvable:$true] %s14_s10 }
   0x2   :  { %17 = dma.hbm_to_vmem [thread:$0]  %s13_s8, 256, %s15_s10, [#allocation4]  }
   0x3   :  { %74 = dma.done.wait [#allocation4], 256  }
   0x4   :  { %75 = vsyncadd [#allocation4], 4294967040  ;;  %vm26_vm0 = vcmask 7168   ;;  %v77_v0 = vmov 0.0   ;;  %v28_v1 = vld [vmem:[#allocation3] sm:$0xff]  ;;  %v29_v2 = vld [vmem:[#allocation3 + $0x8] sm:$0xff] }
   0x5   :  { %27 = vst.msk [vmem:[#allocation2] sm:$0xff] %vm26_vm0, %v77_v0  ;;  %v31_v3 = vadd.f32 %v29_v2, %v28_v1 }
   0x7   :  { %32 = vadd.xlane.f32.xlu0 %v31_v3 }
   0xc   :  { %v30_v4 = vld [vmem:[#allocation2] sm:$0xff] }
  0x7a   :  { %v33_v5 = vpop.xlane.xlu0 %32 }
  0x7b   :  { %v34_v6 = vadd.f32 %v33_v5, %v30_v4 }
  0x7d   :  { %36 = vst.msk [vmem:[#allocation2] sm:$0xff] %vm26_vm0, %v34_v6 }
  0x84   :  { %v40_v7 = vld [vmem:[#allocation2] sm:$0xff] }
  0x85   :  { %v41_v8 = vmul.f32 0.00390625, %v40_v7 }
  0x87   :  { %42 = vst.msk [vmem:[%s95_s1] sm:$0xff] %vm26_vm0, %v41_v8 }
  0x88   :  { %47 = vsyncpa [#allocation4], 1 }

</bundles_post_ra>
